<compile_context>
chip_gen: v7x
topology: tpu7x:2x2x1
jax: 0.10.0
libtpu: 0.0.40
codegen_flags: <defaults>
</compile_context>

<pallas_src>
import functools

import jax
import jax.numpy as jnp
from jax.experimental import pallas as pl
from jax.experimental.pallas import tpu as pltpu


def _round_up(v, m):
    return (v + m - 1) // m * m


def _cdiv(a, b):
    return (a + b - 1) // b


def _pick_tiles(n, c, e):
    """Choose (tm, tc) and estimate the VMEM working set in bytes."""
    n8 = _round_up(max(n, 8), 8)
    c8 = _round_up(max(c, 8), 8)

    # Keep the whole pre-normalized bf16 proxy matrix as a single resident
    # tile when it is small; otherwise stream large C tiles.
    if c8 * e * 2 <= (12 << 20):
        tc = c8
    else:
        tc = min(1024, c8)

    tm = min(512, n8)
    # v7x megacore: make sure the "parallel" N axis has >= 2 blocks when there
    # is enough work to split across the two TensorCores.
    if n8 >= 128 and _cdiv(n8, tm) == 1:
        tm = _round_up(_cdiv(n8, 2), 8)

    def ws(tm_, tc_):
        return (2 * tm_ * e * 4            # X block, double buffered, f32
                + 2 * tc_ * e * 2          # P tile, double buffered, bf16
                + tm_ * e * 2              # normalized-X scratch, bf16
                + 6 * tm_ * tc_ * 4        # (tm,tc) logits / exp temps, f32
                + 8 * tm_ * 128 * 4)       # lane-padded (tm,1) accum/labels/out

    budget = 40 << 20                      # conservative for v7x (64 MiB phys)
    while ws(tm, tc) > budget:
        if tc > 512:
            tc = _round_up(tc // 2, 8)
        elif tm > 64:
            tm = _round_up(tm // 2, 8)
        else:
            break
    return tm, tc, ws(tm, tc)


def _proxy_nca_kernel(x_ref, p_ref, t_ref, out_ref,
                      xn_sc, m_sc, l_sc, lab_sc,
                      *, scale, c_actual, c_pad, tc):
    # x_ref: (TM, E) f32   p_ref: (TC, E) bf16 (pre-normalized, pre-scaled)
    # t_ref: (TM, 1) i32   out_ref: (TM, 1) f32 per-sample losses
    j = pl.program_id(1)
    nj = pl.num_programs(1)

    @pl.when(j == 0)
    def _init():
        # Normalize + scale X rows once per N block (f32 stats, bf16 store).
        x = x_ref[...]
        ssq = jnp.sum(x * x, axis=-1, keepdims=True)
        xn = (scale * x) * jax.lax.rsqrt(jnp.maximum(ssq, 1e-24))
        xn_sc[...] = xn.astype(jnp.bfloat16)
        m_sc[...] = jnp.full_like(m_sc, -jnp.inf)
        l_sc[...] = jnp.zeros_like(l_sc)
        lab_sc[...] = jnp.zeros_like(lab_sc)

    # bf16 x bf16 -> f32 MXU matmul; contract last dims (no transpose).
    xp = jax.lax.dot_general(
        xn_sc[...], p_ref[...],
        dimension_numbers=(((1,), (1,)), ((), ())),
        preferred_element_type=jnp.float32)                 # (TM, TC) f32

    # ||xn||^2 = ||pn||^2 = scale^2 exactly, so the clamped squared distance
    # is D = max(2*scale^2 - 2*xp, 0); work directly with -D.
    neg_d = jnp.minimum(2.0 * xp - 2.0 * (scale * scale), 0.0)

    col = j * tc + jax.lax.broadcasted_iota(jnp.int32, neg_d.shape, 1)

    # Label term: -D[i, t_i] contribution from this tile (labels are always
    # valid class indices, so no padding mask is needed here).
    is_lab = col == t_ref[...]
    lab_sc[...] += jnp.sum(jnp.where(is_lab, neg_d, 0.0),
                           axis=-1, keepdims=True)

    def _online_lse(nd):
        m_new = jnp.maximum(m_sc[...], jnp.max(nd, axis=-1, keepdims=True))
        alpha = jnp.exp(m_sc[...] - m_new)
        l_sc[...] = alpha * l_sc[...] + jnp.sum(jnp.exp(nd - m_new),
                                                axis=-1, keepdims=True)
        m_sc[...] = m_new

    if c_pad == c_actual:
        # No padded classes anywhere: never build the mask.
        _online_lse(neg_d)
    else:
        # Only the last C tile can contain padded (zero) proxy rows; keep the
        # mask (it is load-bearing) but pay for it on that tile only.
        @pl.when(j < nj - 1)
        def _interior():
            _online_lse(neg_d)

        @pl.when(j == nj - 1)
        def _last():
            _online_lse(jnp.where(col < c_actual, neg_d, -jnp.inf))

    @pl.when(j == nj - 1)
    def _finalize():
        # loss_i = D[i, t_i] + logsumexp(-D[i, :])
        out_ref[...] = m_sc[...] + jnp.log(l_sc[...]) - lab_sc[...]


def proxy_nca_prob_loss(x, proxies, labels, scale):
    n, e = x.shape
    c, e_p = proxies.shape
    assert e == e_p

    tm, tc, ws_bytes = _pick_tiles(n, c, e)
    n_pad = _round_up(n, tm)
    c_pad = _round_up(c, tc)

    # Pre-normalize + pre-scale proxies once (f32 math) and store bf16 for the
    # MXU / to halve streamed-P HBM bytes.
    p32 = proxies.astype(jnp.float32)
    pssq = jnp.sum(p32 * p32, axis=-1, keepdims=True)
    pn = ((float(scale) * p32) * jax.lax.rsqrt(jnp.maximum(pssq, 1e-24))
          ).astype(jnp.bfloat16)

    x32 = x.astype(jnp.float32)
    t32 = labels.astype(jnp.int32)
    if n_pad != n:
        x32 = jnp.pad(x32, ((0, n_pad - n), (0, 0)))
        t32 = jnp.pad(t32, ((0, n_pad - n),))
    if c_pad != c:
        pn = jnp.pad(pn, ((0, c_pad - c), (0, 0)))
    t2 = t32.reshape(n_pad, 1)

    kernel = functools.partial(_proxy_nca_kernel, scale=float(scale),
                               c_actual=c, c_pad=c_pad, tc=tc)

    vmem_limit = int(min(max(int(ws_bytes * 1.5) + (4 << 20), 16 << 20),
                         56 << 20))

    per_sample = pl.pallas_call(
        kernel,
        out_shape=jax.ShapeDtypeStruct((n_pad, 1), jnp.float32),
        grid_spec=pltpu.PrefetchScalarGridSpec(
            num_scalar_prefetch=0,
            grid=(n_pad // tm, c_pad // tc),
            in_specs=[
                pl.BlockSpec((tm, e), lambda i, j: (i, 0)),   # X rows (f32)
                pl.BlockSpec((tc, e), lambda i, j: (j, 0)),   # proxy tile (bf16)
                pl.BlockSpec((tm, 1), lambda i, j: (i, 0)),   # labels
            ],
            out_specs=pl.BlockSpec((tm, 1), lambda i, j: (i, 0)),
            scratch_shapes=[
                pltpu.VMEM((tm, e), jnp.bfloat16),   # normalized X (bf16 for MXU)
                pltpu.VMEM((tm, 1), jnp.float32),    # running max (f32)
                pltpu.VMEM((tm, 1), jnp.float32),    # running sum (f32)
                pltpu.VMEM((tm, 1), jnp.float32),    # -D[i, label] accumulator
            ]),
        compiler_params=pltpu.CompilerParams(
            dimension_semantics=("parallel", "arbitrary"),
            vmem_limit_bytes=vmem_limit),
    )(x32, pn, t2)

    return jnp.mean(per_sample[:n, 0])


def _reference_loss(x, proxies, labels, scale):
    # Pure-JAX f32 reference of the PyTorch forward.
    xn = scale * x / jnp.maximum(jnp.linalg.norm(x, axis=-1, keepdims=True), 1e-12)
    pn = scale * proxies / jnp.maximum(
        jnp.linalg.norm(proxies, axis=-1, keepdims=True), 1e-12)
    d = (jnp.sum(xn * xn, -1, keepdims=True)
         + jnp.sum(pn * pn, -1)[None, :]
         - 2.0 * xn @ pn.T)
    d = jnp.maximum(d, 0.0)
    log_sm = jax.nn.log_softmax(-d, axis=-1)
    onehot = jax.nn.one_hot(labels, proxies.shape[0], dtype=jnp.float32)
    return jnp.mean(jnp.sum(-onehot * log_sm, axis=-1))


if __name__ == "__main__":
    nb_classes = 16
    sz_embed = 32
    batch = 8
    scale = 3.0

    key = jax.random.PRNGKey(0)
    k_p, k_x, k_t = jax.random.split(key, 3)

    # torch.nn.Parameter(torch.randn(nb_classes, sz_embed) / 8)
    proxies = jax.random.normal(k_p, (nb_classes, sz_embed), dtype=jnp.float32) / 8.0
    x = jax.random.normal(k_x, (batch, sz_embed), dtype=jnp.float32)
    labels = jax.random.randint(k_t, (batch,), 0, nb_classes, dtype=jnp.int32)

    loss = proxy_nca_prob_loss(x, proxies, labels, scale)
    loss = jax.block_until_ready(loss)

    ref = _reference_loss(x, proxies, labels, scale)
    # bf16 MXU operands (f32 accumulation / softmax) -> looser tolerance than
    # a pure-f32 comparison.
    assert jnp.allclose(loss, ref, atol=5e-2, rtol=5e-2), (loss, ref)

    print("KERNEL_OK")
</pallas_src>

<mosaic_0001>
module attributes {stable_mosaic.version = 11 : i64} {
  func.func @_proxy_nca_kernel(%arg0: i32, %arg1: i32, %arg2: memref<8x32xf32, #tpu.memory_space<vmem>>, %arg3: memref<16x32xbf16, #tpu.memory_space<vmem>>, %arg4: memref<8x1xi32, #tpu.memory_space<vmem>>, %arg5: memref<8x1xf32, #tpu.memory_space<vmem>>, %arg6: memref<8x32xbf16, #tpu.memory_space<vmem>>, %arg7: memref<8x1xf32, #tpu.memory_space<vmem>>, %arg8: memref<8x1xf32, #tpu.memory_space<vmem>>, %arg9: memref<8x1xf32, #tpu.memory_space<vmem>>) attributes {dimension_semantics = [#tpu.dimension_semantics<parallel>, #tpu.dimension_semantics<arbitrary>], iteration_bounds = array<i64: 1, 1>, scalar_prefetch = 0 : i64, scratch_operands = 4 : i64, tpu.core_type = #tpu.core_type<tc>, window_params = [{transform_indices = @transform_0, window_bounds = array<i64: 8, 32>}, {transform_indices = @transform_1, window_bounds = array<i64: 16, 32>}, {transform_indices = @transform_2, window_bounds = array<i64: 8, 1>}, {transform_indices = @transform_3, window_bounds = array<i64: 8, 1>}]} {
    %c0_i32 = arith.constant 0 : i32
    %0 = arith.cmpi eq, %arg1, %c0_i32 : i32
    %1 = arith.extui %0 : i1 to i32
    %c0_i32_0 = arith.constant 0 : i32
    %2 = arith.cmpi ne, %1, %c0_i32_0 : i32
    scf.if %2 {
      %c0_29 = arith.constant 0 : index
      %c0_30 = arith.constant 0 : index
      %46 = vector.load %arg2[%c0_29, %c0_30] : memref<8x32xf32, #tpu.memory_space<vmem>>, vector<8x32xf32>
      %47 = arith.mulf %46, %46 : vector<8x32xf32>
      %cst_31 = arith.constant dense<0.000000e+00> : vector<8xf32>
      %48 = vector.multi_reduction <add>, %47, %cst_31 [1] : vector<8x32xf32> to vector<8xf32>
      %49 = vector.shape_cast %48 : vector<8xf32> to vector<8x1xf32>
      %cst_32 = arith.constant 3.000000e+00 : f32
      %50 = vector.broadcast %cst_32 : f32 to vector<8x32xf32>
      %51 = arith.mulf %50, %46 : vector<8x32xf32>
      %cst_33 = arith.constant 1.000000e-24 : f32
      %52 = vector.broadcast %cst_33 : f32 to vector<8x1xf32>
      %53 = arith.maximumf %49, %52 : vector<8x1xf32>
      %54 = math.rsqrt %53 : vector<8x1xf32>
      %55 = vector.broadcast %54 : vector<8x1xf32> to vector<8x32xf32>
      %56 = arith.mulf %51, %55 : vector<8x32xf32>
      %57 = arith.truncf %56 : vector<8x32xf32> to vector<8x32xbf16>
      %c0_34 = arith.constant 0 : index
      %c0_35 = arith.constant 0 : index
      %58 = vector.load %arg6[%c0_34, %c0_35] : memref<8x32xbf16, #tpu.memory_space<vmem>>, vector<8x32xbf16>
      tpu.vector_store %arg6[%c0_34, %c0_35], %57 {strides = array<i32>} : memref<8x32xbf16, #tpu.memory_space<vmem>>, vector<8x32xbf16>,
      %cst_36 = arith.constant 0xFF800000 : f32
      %59 = vector.broadcast %cst_36 : f32 to vector<8x1xf32>
      %c0_37 = arith.constant 0 : index
      %c0_38 = arith.constant 0 : index
      %60 = vector.load %arg7[%c0_37, %c0_38] : memref<8x1xf32, #tpu.memory_space<vmem>>, vector<8x1xf32>
      tpu.vector_store %arg7[%c0_37, %c0_38], %59 {strides = array<i32>} : memref<8x1xf32, #tpu.memory_space<vmem>>, vector<8x1xf32>,
      %cst_39 = arith.constant 0.000000e+00 : f32
      %61 = vector.broadcast %cst_39 : f32 to vector<8x1xf32>
      %c0_40 = arith.constant 0 : index
      %c0_41 = arith.constant 0 : index
      %62 = vector.load %arg8[%c0_40, %c0_41] : memref<8x1xf32, #tpu.memory_space<vmem>>, vector<8x1xf32>
      tpu.vector_store %arg8[%c0_40, %c0_41], %61 {strides = array<i32>} : memref<8x1xf32, #tpu.memory_space<vmem>>, vector<8x1xf32>,
      %cst_42 = arith.constant 0.000000e+00 : f32
      %63 = vector.broadcast %cst_42 : f32 to vector<8x1xf32>
      %c0_43 = arith.constant 0 : index
      %c0_44 = arith.constant 0 : index
      %64 = vector.load %arg9[%c0_43, %c0_44] : memref<8x1xf32, #tpu.memory_space<vmem>>, vector<8x1xf32>
      tpu.vector_store %arg9[%c0_43, %c0_44], %63 {strides = array<i32>} : memref<8x1xf32, #tpu.memory_space<vmem>>, vector<8x1xf32>,
    } else {
    }
    %c0 = arith.constant 0 : index
    %c0_1 = arith.constant 0 : index
    %3 = vector.load %arg6[%c0, %c0_1] : memref<8x32xbf16, #tpu.memory_space<vmem>>, vector<8x32xbf16>
    %c0_2 = arith.constant 0 : index
    %c0_3 = arith.constant 0 : index
    %4 = vector.load %arg3[%c0_2, %c0_3] : memref<16x32xbf16, #tpu.memory_space<vmem>>, vector<16x32xbf16>
    %cst = arith.constant dense<0.000000e+00> : vector<8x16xf32>
    %5 = tpu.matmul %3, %4, %cst {dimension_numbers = #tpu.dot_dimension_numbers<[1], [1], [0], [0], [0, 0, 1, 0], [], []>} : vector<8x32xbf16>, vector<16x32xbf16>, vector<8x16xf32> -> vector<8x16xf32>
    %cst_4 = arith.constant 2.000000e+00 : f32
    %6 = vector.broadcast %cst_4 : f32 to vector<8x16xf32>
    %7 = arith.mulf %6, %5 : vector<8x16xf32>
    %cst_5 = arith.constant 1.800000e+01 : f32
    %8 = vector.broadcast %cst_5 : f32 to vector<8x16xf32>
    %9 = arith.subf %7, %8 : vector<8x16xf32>
    %cst_6 = arith.constant 0.000000e+00 : f32
    %10 = vector.broadcast %cst_6 : f32 to vector<8x16xf32>
    %11 = arith.minimumf %9, %10 : vector<8x16xf32>
    %c16_i32 = arith.constant 16 : i32
    %12 = arith.muli %arg1, %c16_i32 : i32
    %13 = tpu.iota {dimensions = array<i32: 1>} : vector<8x16xi32>
    %14 = vector.broadcast %12 : i32 to vector<8x16xi32>
    %15 = arith.addi %14, %13 : vector<8x16xi32>
    %c0_7 = arith.constant 0 : index
    %c0_8 = arith.constant 0 : index
    %16 = vector.load %arg4[%c0_7, %c0_8] : memref<8x1xi32, #tpu.memory_space<vmem>>, vector<8x1xi32>
    %17 = vector.broadcast %16 : vector<8x1xi32> to vector<8x16xi32>
    %18 = arith.cmpi eq, %15, %17 : vector<8x16xi32>
    %c0_9 = arith.constant 0 : index
    %c0_10 = arith.constant 0 : index
    %19 = vector.load %arg9[%c0_9, %c0_10] : memref<8x1xf32, #tpu.memory_space<vmem>>, vector<8x1xf32>
    %cst_11 = arith.constant 0.000000e+00 : f32
    %20 = vector.broadcast %cst_11 : f32 to vector<8x16xf32>
    %21 = arith.select %18, %11, %20 : vector<8x16xi1>, vector<8x16xf32>
    %cst_12 = arith.constant dense<0.000000e+00> : vector<8xf32>
    %22 = vector.multi_reduction <add>, %21, %cst_12 [1] : vector<8x16xf32> to vector<8xf32>
    %23 = vector.shape_cast %22 : vector<8xf32> to vector<8x1xf32>
    %24 = arith.addf %19, %23 : vector<8x1xf32>
    %c0_13 = arith.constant 0 : index
    %c0_14 = arith.constant 0 : index
    %25 = vector.load %arg9[%c0_13, %c0_14] : memref<8x1xf32, #tpu.memory_space<vmem>>, vector<8x1xf32>
    tpu.vector_store %arg9[%c0_13, %c0_14], %24 {strides = array<i32>} : memref<8x1xf32, #tpu.memory_space<vmem>>, vector<8x1xf32>,
    %c0_15 = arith.constant 0 : index
    %c0_16 = arith.constant 0 : index
    %26 = vector.load %arg7[%c0_15, %c0_16] : memref<8x1xf32, #tpu.memory_space<vmem>>, vector<8x1xf32>
    %cst_17 = arith.constant dense<0xFF800000> : vector<8xf32>
    %27 = vector.multi_reduction <maximumf>, %11, %cst_17 [1] : vector<8x16xf32> to vector<8xf32>
    %28 = vector.shape_cast %27 : vector<8xf32> to vector<8x1xf32>
    %29 = arith.maximumf %26, %28 : vector<8x1xf32>
    %c0_18 = arith.constant 0 : index
    %c0_19 = arith.constant 0 : index
    %30 = vector.load %arg7[%c0_18, %c0_19] : memref<8x1xf32, #tpu.memory_space<vmem>>, vector<8x1xf32>
    %31 = arith.subf %30, %29 : vector<8x1xf32>
    %32 = math.exp %31 : vector<8x1xf32>
    %c0_20 = arith.constant 0 : index
    %c0_21 = arith.constant 0 : index
    %33 = vector.load %arg8[%c0_20, %c0_21] : memref<8x1xf32, #tpu.memory_space<vmem>>, vector<8x1xf32>
    %34 = arith.mulf %32, %33 : vector<8x1xf32>
    %35 = vector.broadcast %29 : vector<8x1xf32> to vector<8x16xf32>
    %36 = arith.subf %11, %35 : vector<8x16xf32>
    %37 = math.exp %36 : vector<8x16xf32>
    %cst_22 = arith.constant dense<0.000000e+00> : vector<8xf32>
    %38 = vector.multi_reduction <add>, %37, %cst_22 [1] : vector<8x16xf32> to vector<8xf32>
    %39 = vector.shape_cast %38 : vector<8xf32> to vector<8x1xf32>
    %40 = arith.addf %34, %39 : vector<8x1xf32>
    %c0_23 = arith.constant 0 : index
    %c0_24 = arith.constant 0 : index
    %41 = vector.load %arg8[%c0_23, %c0_24] : memref<8x1xf32, #tpu.memory_space<vmem>>, vector<8x1xf32>
    tpu.vector_store %arg8[%c0_23, %c0_24], %40 {strides = array<i32>} : memref<8x1xf32, #tpu.memory_space<vmem>>, vector<8x1xf32>,
    %c0_25 = arith.constant 0 : index
    %c0_26 = arith.constant 0 : index
    %42 = vector.load %arg7[%c0_25, %c0_26] : memref<8x1xf32, #tpu.memory_space<vmem>>, vector<8x1xf32>
    tpu.vector_store %arg7[%c0_25, %c0_26], %29 {strides = array<i32>} : memref<8x1xf32, #tpu.memory_space<vmem>>, vector<8x1xf32>,
    %c0_i32_27 = arith.constant 0 : i32
    %43 = arith.cmpi eq, %arg1, %c0_i32_27 : i32
    %44 = arith.extui %43 : i1 to i32
    %c0_i32_28 = arith.constant 0 : i32
    %45 = arith.cmpi ne, %44, %c0_i32_28 : i32
    scf.if %45 {
      %c0_29 = arith.constant 0 : index
      %c0_30 = arith.constant 0 : index
      %46 = vector.load %arg7[%c0_29, %c0_30] : memref<8x1xf32, #tpu.memory_space<vmem>>, vector<8x1xf32>
      %c0_31 = arith.constant 0 : index
      %c0_32 = arith.constant 0 : index
      %47 = vector.load %arg8[%c0_31, %c0_32] : memref<8x1xf32, #tpu.memory_space<vmem>>, vector<8x1xf32>
      %48 = math.log %47 : vector<8x1xf32>
      %49 = arith.addf %46, %48 : vector<8x1xf32>
      %c0_33 = arith.constant 0 : index
      %c0_34 = arith.constant 0 : index
      %50 = vector.load %arg9[%c0_33, %c0_34] : memref<8x1xf32, #tpu.memory_space<vmem>>, vector<8x1xf32>
      %51 = arith.subf %49, %50 : vector<8x1xf32>
      %c0_35 = arith.constant 0 : index
      %c0_36 = arith.constant 0 : index
      %52 = vector.load %arg5[%c0_35, %c0_36] : memref<8x1xf32, #tpu.memory_space<vmem>>, vector<8x1xf32>
      tpu.vector_store %arg5[%c0_35, %c0_36], %51 {strides = array<i32>} : memref<8x1xf32, #tpu.memory_space<vmem>>, vector<8x1xf32>,
    } else {
    }
    return
  }
  func.func @transform_0(%arg0: i32, %arg1: i32) -> (i32, i32) {
    %c0_i32 = arith.constant 0 : i32
    %c0_i32_0 = arith.constant 0 : i32
    return %arg0, %c0_i32 : i32, i32
  }
  func.func @transform_1(%arg0: i32, %arg1: i32) -> (i32, i32) {
    %c0_i32 = arith.constant 0 : i32
    %c0_i32_0 = arith.constant 0 : i32
    return %arg1, %c0_i32 : i32, i32
  }
  func.func @transform_2(%arg0: i32, %arg1: i32) -> (i32, i32) {
    %c0_i32 = arith.constant 0 : i32
    %c0_i32_0 = arith.constant 0 : i32
    return %arg0, %c0_i32 : i32, i32
  }
  func.func @transform_3(%arg0: i32, %arg1: i32) -> (i32, i32) {
    %c0_i32 = arith.constant 0 : i32
    %c0_i32_0 = arith.constant 0 : i32
    return %arg0, %c0_i32 : i32, i32
  }
}

</mosaic_0001>

<bundles_post_ra>
// kernel: tpu_custom_call.1
= control target key start
LH: loop header
LB: loop body
LE: loop exit
PB: predicated region body
PF: predicated region fallthrough
CT: control target
= control target key end

     0   :  { %8 = vsyncpa [#allocation7], 0  ;;  %s220_s12 = smov [#allocation6]   ;;  %s281_s0 = inlined_call_operand.vmem [shape: f32[8,32], index: 0, kind: input, shape index: {}]   ;;  %s282_s1 = inlined_call_operand.hbm [shape: bf16[16,32], index: 1, kind: input, shape index: {}]   ;;  %s283_s2 = inlined_call_operand.vmem [shape: s32[8,1], index: 2, kind: input, shape index: {}]   ;;  %s284_s3 = inlined_call_operand.vmem [shape: f32[8,1], index: 3, kind: output, shape index: {}]  }
   0x1   :  { %s16_s13 = sshll.u32 %s220_s12, 4  ;;  %s196_s16 = scalar_lea.hbm %s282_s1, 128  ;;  %s17_s13 = int_to_ptr.vmem [resolvable:$true] %s16_s13 }
   0x2   :  { %p197_p0 = scmp.ne.s32.totalorder %s282_s1, %s196_s16  ;;  %p200_p1 = scmp.lt.u32.totalorder %s196_s16, %s282_s1 }
   0x4   :  { %p202_p2 = pnand %p200_p1, %p197_p0 }
   0x6   :  { %205 = shalt.err (!%p202_p2)
}
   0x7   :  { %s206_s21 = scalar_lea.vmem %s17_s13, 128  ;;  %p211_p4 = scmp.lt.s32.totalorder %s17_s13, %s17_s13 }
   0x8   :  { %p207_p3 = scmp.ne.s32.totalorder %s17_s13, %s206_s21  ;;  %p212_p5 = scmp.lt.s32.totalorder %s206_s21, %s206_s21 }
   0xa   :  { %p213_p6 = por %p212_p5, %p211_p4 }
   0xc   :  { %p214_p7 = pnand %p213_p6, %p207_p3 }
   0xe   :  { %217 = shalt.err (!%p214_p7)
}
   0xf   :  { %s221_s22 = smov 64   ;;  %s222_s23 = smov 4  }
  0x10   :  { %22 = dma.hbm_to_vmem [thread:$0]  %s282_s1, 128, %s17_s13, [#allocation7], %s221_s22, %s221_s22, %s222_s23  }
  0x11   :  { %218 = dma.done.wait [#allocation7], 128  }
  0x12   :  { %219 = vsyncadd [#allocation7], 4294967168  ;;  %v33_v0 = vld [vmem:[%s281_s0] sm:$0xff]  ;;  %vm35_vm0 = vcmask 261120   ;;  %vm46_vm1 = vcmask 7168   ;;  %v223_v4 = vmov 0.0   ;;  %v109_v28 = vlaneseq }
  0x13   :  { %v34_v1 = vmul.f32 %v33_v0, %v33_v0  ;;  %v187_v3 = vld [vmem:[#allocation6] sm:$0xff]   ;;  %172 = vmatprep.subr.bf16.mxu0 %v223_v4  ;;  %48 = vst.msk [vmem:[#allocation4] sm:$0xff] %vm46_vm1, %v223_v4  ;;  %49 = vst.msk [vmem:[#allocation5] sm:$0xff] %vm46_vm1, %v223_v4  ;;  %vm224_vm2 = vmmov 0   ;;  %v39_v8 = vmul.f32 3.0, %v33_v0  ;;  %vm44_vm3 = vcmask 257024  }
  0x14   :  { %v63_v5 = vsel %vm35_vm0, %v187_v3, 0  ;;  %174 = vmatprep.mubr.msk.bf16.mxu0 %vm224_vm2, %v223_v4  ;;  %v225_v13 = vmov -inf   ;;  %vm120_vm4 = vcmask 130048   ;;  %v226_v22 = vmov 0   ;;  %v113_v27 = vld [vmem:[%s283_s2] sm:$0xff] }
  0x15   :  { %v36_v2 = vsel %vm35_vm0, %v34_v1, 0.0  ;;  %173 = vmatpush3.bf16.xpose.msra.mxu0 %v63_v5  ;;  %47 = vst.msk [vmem:[#allocation3] sm:$0xff] %vm46_vm1, %v225_v13  ;;  %185 = vset.pattern.permute.xlu1 %v226_v22  ;;  %v110_v31 = vand.u32 127, %v109_v28 }
  0x16   :  { %37 = vadd.xlane.f32.xlu0 %v36_v2 }
  0x17   :  { %186 = vset.pattern.permute.xlu0 %v226_v22 }
  0x1a   :  { %v118_v39 = vld [vmem:[#allocation5] sm:$0xff]  ;;  %v135_v43 = vld [vmem:[#allocation4] sm:$0xff] }
  0x1c   :  { %v127_v23 = vld [vmem:[#allocation3] sm:$0xff] }
  0xa3   :  { %v38_v6 = vpop.xlane.xlu0 %37 }
  0xa4   :  { %v40_v7 = vmax.f32 %v38_v6, 1e-24 }
  0xa6   :  { %188 = vrsqrt.f32 %v40_v7 }
  0xb0   :  { %v189_v9 = vpop.eup %188 }
  0xb1   :  { %v42_v10 = vmul.f32 %v189_v9, %v39_v8 }
  0xb3   :  { %v43_v11 = vpack.c.bf16 %v42_v10, %v42_v10 }
  0xb5   :  { %45 = vst.msk [vmem:[#allocation2] sm:$0xf] %vm44_vm3, %v43_v11 }
  0xbc   :  { %v50_v12 = vld [vmem:[#allocation2] sm:$0xf] }
  0xbd   :  { %175 = vmatmul.mubr.msk.bf16.vlgmr.msra.gmra.mrb[0].mxu0 %vm35_vm0, %v50_v12 }
 0x190   :  { %v99_v14 = vpop.f32.mrb[0].mxu0 }
 0x191   :  { %v105_v15 = vmul.f32 2.0, %v99_v14  ;;  %v176_v16 = vpop.f32.mrb[1].mxu0 }
 0x192   :  { %v102_v17 = vpop.f32.mrb[2].mxu0 }
 0x193   :  { %v169_v18 = vadd.f32 -18.0, %v105_v15  ;;  %v177_v19 = vpop.f32.mrb[3].mxu0 }
 0x195   :  { %v107_v20 = vmin.f32 %v169_v18, 0.0 }
 0x197   :  { %v128_v21 = vsel %vm120_vm4, %v107_v20, -inf }
 0x198   :  { %129 = vmax.xlane.f32.xlu0 %v128_v21 }
 0x225   :  { %v130_v24 = vpop.xlane.xlu0 %129 }
 0x226   :  { %v131_v25 = vmax.f32 %v127_v23, %v130_v24 }
 0x228   :  { %v132_v26 = vsub.f32 %v127_v23, %v131_v25  ;;  %150 = vst.msk [vmem:[#allocation3] sm:$0xff] %vm46_vm1, %v131_v25  ;;  %139 = vperm.xlu1 %185, %v131_v25  }
 0x22a   :  { %v133_v38 = vmul.f32 1.442695, %v132_v26 }
 0x22c   :  { %115 = vperm.xlu1 %185, %v113_v27  }
 0x22f   :  { %v154_v50 = vld [vmem:[#allocation3] sm:$0xff] }
 0x2a7   :  { %v140_v29 = vpop.permute.xlu1 %139 }
 0x2a8   :  { %v142_v30 = vsub.f32 %v107_v20, %v140_v29 }
 0x2aa   :  { %v143_v32 = vmul.f32 1.442695, %v142_v30 }
 0x2ab   :  { %v116_v33 = vpop.permute.xlu1 %115 }
 0x2ac   :  { %190 = vpow2.f32 %v143_v32  ;;  %vm117_vm5 = vcmp.eq.s32.totalorder %v110_v31, %v116_v33 }
 0x2ad   :  { %v119_v34 = vsel %vm117_vm5, %v107_v20, 0.0  ;;  %192 = vpow2.f32 %v133_v38 }
 0x2ae   :  { %v121_v35 = vsel %vm120_vm4, %v119_v34, 0.0 }
 0x2af   :  { %122 = vadd.xlane.f32.xlu1 %v121_v35 }
 0x2b6   :  { %v191_v36 = vpop.eup %190 }
 0x2b7   :  { %v145_v37 = vsel %vm120_vm4, %v191_v36, 0.0  ;;  %v193_v42 = vpop.eup %192 }
 0x2b8   :  { %146 = vadd.xlane.f32.xlu0 %v145_v37  ;;  %v136_v44 = vmul.f32 %v193_v42, %v135_v43 }
 0x33c   :  { %v123_v40 = vpop.xlane.xlu1 %122 }
 0x33d   :  { %v124_v41 = vadd.f32 %v123_v40, %v118_v39 }
 0x33f   :  { %126 = vst.msk [vmem:[#allocation5] sm:$0xff] %vm46_vm1, %v124_v41 }
 0x345   :  { %v147_v45 = vpop.xlane.xlu0 %146 }
 0x346   :  { %v148_v46 = vadd.f32 %v147_v45, %v136_v44  ;;  %v159_v52 = vld [vmem:[#allocation5] sm:$0xff] }
 0x348   :  { %149 = vst.msk [vmem:[#allocation4] sm:$0xff] %vm46_vm1, %v148_v46 }
 0x34f   :  { %v155_v47 = vld [vmem:[#allocation4] sm:$0xff] }
 0x350   :  { %194 = vlog2.f32 %v155_v47 }
 0x35a   :  { %v195_v48 = vpop.eup %194 }
 0x35b   :  { %v157_v49 = vmul.f32 0.6931472, %v195_v48 }
 0x35d   :  { %v158_v51 = vadd.f32 %v157_v49, %v154_v50 }
 0x35f   :  { %v160_v53 = vsub.f32 %v158_v51, %v159_v52 }
 0x361   :  { %161 = vst.msk [vmem:[%s284_s3] sm:$0xff] %vm46_vm1, %v160_v53 }
 0x362   :  { %166 = vsyncpa [#allocation7], 1 }

</bundles_post_ra>
